<compile_context>
chip_gen: v7x
topology: tpu7x:2x2x1
jax: 0.10.0
libtpu: 0.0.40
codegen_flags: <defaults>
</compile_context>

<pallas_src>
import functools

import jax
import jax.numpy as jnp
from jax.experimental import pallas as pl
from jax.experimental.pallas import tpu as pltpu


def _edge_mlp_kernel(hs_ref, hd_ref, w1a_ref, w1b_ref, b1_ref, w2_ref, b2_ref,
                     out_ref):
    # hs_ref, hd_ref : (TE, F)  bf16  gathered src/dst node features (one tile)
    # w1a_ref, w1b_ref: (F, F)  bf16  W1 split along its input dimension
    # b1_ref         : (1, F)   f32
    # w2_ref         : (8, F)   f32   W2 row replicated across 8 sublanes
    # b2_ref         : (1, 1)   f32   (SMEM scalar)
    # out_ref        : (8, TE)  f32   row 0 holds the scores (lane-dense)
    z = jnp.dot(hs_ref[...], w1a_ref[...], preferred_element_type=jnp.float32)
    z = z + jnp.dot(hd_ref[...], w1b_ref[...],
                    preferred_element_type=jnp.float32)
    z = jnp.maximum(z + b1_ref[...], 0.0)                  # ReLU, (TE, F) f32

    # Second Linear fused with the column->row relayout:
    #   (8, F) . (TE, F)^T -> (8, TE); all 8 rows identical (W2 replicated).
    logits = jax.lax.dot_general(
        w2_ref[...], z,
        dimension_numbers=(((1,), (1,)), ((), ())),
        preferred_element_type=jnp.float32)

    out_ref[...] = jax.nn.sigmoid(logits + b2_ref[0, 0]).astype(out_ref.dtype)


@functools.partial(jax.jit, static_argnames=("tile_e",))
def mlp_predictor_scores(h, src, dst, w1, b1, w2, b2, *, tile_e=2048):
    """h: (N, F) node features; src/dst: (E,) int32 edge endpoints.

    Parameter layout: w1 is (2F, F) (in, out), b1 is (F,) or (1, F),
    w2 is (F,) or (F, 1), b2 is scalar-like — i.e. transposed vs. torch.
    """
    E = src.shape[0]
    F = h.shape[1]
    n_tiles = pl.cdiv(E, tile_e)
    e_pad = n_tiles * tile_e

    # Pad ragged E with node index 0 (always valid); padded scores are sliced off.
    src_p = jnp.pad(src, (0, e_pad - E))
    dst_p = jnp.pad(dst, (0, e_pad - E))

    cdt = jnp.bfloat16
    hc = h.astype(cdt)
    hs = hc[src_p]                      # (E_pad, F) bf16 — no concat intermediate
    hd = hc[dst_p]                      # (E_pad, F) bf16

    w1a = w1[:F, :].astype(cdt)                                        # (F, F)
    w1b = w1[F:, :].astype(cdt)                                        # (F, F)
    b1r = jnp.reshape(b1, (1, F)).astype(jnp.float32)                  # (1, F)
    w2r = jnp.broadcast_to(jnp.reshape(w2, (1, F)), (8, F)).astype(jnp.float32)
    b2r = jnp.reshape(b2, (1, 1)).astype(jnp.float32)                  # (1, 1)

    out = pl.pallas_call(
        _edge_mlp_kernel,
        out_shape=jax.ShapeDtypeStruct((8, e_pad), jnp.float32),
        grid_spec=pltpu.PrefetchScalarGridSpec(
            num_scalar_prefetch=0,
            grid=(n_tiles,),
            in_specs=[
                pl.BlockSpec((tile_e, F), lambda i: (i, 0)),   # hs tile
                pl.BlockSpec((tile_e, F), lambda i: (i, 0)),   # hd tile
                pl.BlockSpec((F, F), lambda i: (0, 0)),        # W1a (resident)
                pl.BlockSpec((F, F), lambda i: (0, 0)),        # W1b (resident)
                pl.BlockSpec((1, F), lambda i: (0, 0)),        # b1  (resident)
                pl.BlockSpec((8, F), lambda i: (0, 0)),        # W2  (resident)
                pl.BlockSpec(memory_space=pltpu.MemorySpace.SMEM),  # b2 scalar
            ],
            out_specs=pl.BlockSpec((8, tile_e), lambda i: (0, i)),
        ),
        compiler_params=pltpu.CompilerParams(
            dimension_semantics=("parallel",),   # megacore sharding on v7x
        ),
    )(hs, hd, w1a, w1b, b1r, w2r, b2r)

    # Row 0 carries the scores; drop the tail padding -> (E,)
    return out[0, :E]


def _torch_linear_init(key, in_features, out_features):
    """Deterministic init matching nn.Linear's U(-1/sqrt(in), 1/sqrt(in))."""
    kw, kb = jax.random.split(key)
    bound = 1.0 / jnp.sqrt(jnp.float32(in_features))
    # stored as (in, out) for row-major matmul (transposed vs. torch)
    w = jax.random.uniform(kw, (in_features, out_features), jnp.float32,
                           minval=-bound, maxval=bound)
    b = jax.random.uniform(kb, (1, out_features), jnp.float32,
                           minval=-bound, maxval=bound)
    return w, b


if __name__ == "__main__":
    h_feats = 32
    n_nodes = 64
    n_edges = 1000      # deliberately NOT a multiple of the edge tile
    tile_e = 256        # small demo tile (multi-step grid); default is 2048

    key = jax.random.PRNGKey(0)
    k_h, k_src, k_dst, k_w1, k_w2 = jax.random.split(key, 5)

    h = jax.random.normal(k_h, (n_nodes, h_feats), jnp.float32)
    src = jax.random.randint(k_src, (n_edges,), 0, n_nodes, jnp.int32)
    dst = jax.random.randint(k_dst, (n_edges,), 0, n_nodes, jnp.int32)

    w1, b1 = _torch_linear_init(k_w1, 2 * h_feats, h_feats)
    w2, b2 = _torch_linear_init(k_w2, h_feats, 1)

    scores = mlp_predictor_scores(h, src, dst, w1, b1, w2, b2, tile_e=tile_e)
    scores = jax.block_until_ready(scores)

    # Pure-JAX f32 reference of the same forward pass.
    x_ref = jnp.concatenate([h[src], h[dst]], axis=1)
    ref = jax.nn.sigmoid(jnp.maximum(x_ref @ w1 + b1, 0.0) @ w2 + b2)[:, 0]

    assert scores.shape == (n_edges,)
    max_err = float(jnp.max(jnp.abs(scores - ref)))
    assert jnp.allclose(scores, ref, atol=2e-2, rtol=0.0), max_err
    print("KERNEL_OK")
</pallas_src>

<mosaic_0001>
module attributes {stable_mosaic.version = 11 : i64} {
  func.func @_edge_mlp_kernel(%arg0: i32, %arg1: memref<256x32xbf16, #tpu.memory_space<vmem>>, %arg2: memref<256x32xbf16, #tpu.memory_space<vmem>>, %arg3: memref<32x32xbf16, #tpu.memory_space<vmem>>, %arg4: memref<32x32xbf16, #tpu.memory_space<vmem>>, %arg5: memref<1x32xf32, #tpu.memory_space<vmem>>, %arg6: memref<8x32xf32, #tpu.memory_space<vmem>>, %arg7: memref<1x1xf32, #tpu.memory_space<smem>>, %arg8: memref<8x256xf32, #tpu.memory_space<vmem>>) attributes {dimension_semantics = [#tpu.dimension_semantics<parallel>], iteration_bounds = array<i64: 4>, scalar_prefetch = 0 : i64, scratch_operands = 0 : i64, tpu.core_type = #tpu.core_type<tc>, window_params = [{transform_indices = @transform_0, window_bounds = array<i64: 256, 32>}, {transform_indices = @transform_1, window_bounds = array<i64: 256, 32>}, {pipeline_mode = #tpu.pipeline_mode<synchronous>, transform_indices = @transform_2, window_bounds = array<i64: 32, 32>}, {pipeline_mode = #tpu.pipeline_mode<synchronous>, transform_indices = @transform_3, window_bounds = array<i64: 32, 32>}, {pipeline_mode = #tpu.pipeline_mode<synchronous>, transform_indices = @transform_4, window_bounds = array<i64: 1, 32>}, {pipeline_mode = #tpu.pipeline_mode<synchronous>, transform_indices = @transform_5, window_bounds = array<i64: 8, 32>}, {transform_indices = @transform_6, window_bounds = array<i64: 1, 1>}, {transform_indices = @transform_7, window_bounds = array<i64: 8, 256>}]} {
    %c0 = arith.constant 0 : index
    %c0_0 = arith.constant 0 : index
    %0 = vector.load %arg1[%c0, %c0_0] : memref<256x32xbf16, #tpu.memory_space<vmem>>, vector<256x32xbf16>
    %c0_1 = arith.constant 0 : index
    %c0_2 = arith.constant 0 : index
    %1 = vector.load %arg3[%c0_1, %c0_2] : memref<32x32xbf16, #tpu.memory_space<vmem>>, vector<32x32xbf16>
    %cst = arith.constant dense<0.000000e+00> : vector<256x32xf32>
    %2 = tpu.matmul %0, %1, %cst {dimension_numbers = #tpu.dot_dimension_numbers<[1], [0], [0], [1], [0, 0, 1, 1], [], []>} : vector<256x32xbf16>, vector<32x32xbf16>, vector<256x32xf32> -> vector<256x32xf32>
    %c0_3 = arith.constant 0 : index
    %c0_4 = arith.constant 0 : index
    %3 = vector.load %arg2[%c0_3, %c0_4] : memref<256x32xbf16, #tpu.memory_space<vmem>>, vector<256x32xbf16>
    %c0_5 = arith.constant 0 : index
    %c0_6 = arith.constant 0 : index
    %4 = vector.load %arg4[%c0_5, %c0_6] : memref<32x32xbf16, #tpu.memory_space<vmem>>, vector<32x32xbf16>
    %cst_7 = arith.constant dense<0.000000e+00> : vector<256x32xf32>
    %5 = tpu.matmul %3, %4, %cst_7 {dimension_numbers = #tpu.dot_dimension_numbers<[1], [0], [0], [1], [0, 0, 1, 1], [], []>} : vector<256x32xbf16>, vector<32x32xbf16>, vector<256x32xf32> -> vector<256x32xf32>
    %6 = arith.addf %2, %5 : vector<256x32xf32>
    %c0_8 = arith.constant 0 : index
    %c0_9 = arith.constant 0 : index
    %7 = vector.load %arg5[%c0_8, %c0_9] : memref<1x32xf32, #tpu.memory_space<vmem>>, vector<1x32xf32>
    %8 = vector.broadcast %7 : vector<1x32xf32> to vector<256x32xf32>
    %9 = arith.addf %6, %8 : vector<256x32xf32>
    %cst_10 = arith.constant 0.000000e+00 : f32
    %10 = vector.broadcast %cst_10 : f32 to vector<256x32xf32>
    %11 = arith.maximumf %9, %10 : vector<256x32xf32>
    %c0_11 = arith.constant 0 : index
    %c0_12 = arith.constant 0 : index
    %12 = vector.load %arg6[%c0_11, %c0_12] : memref<8x32xf32, #tpu.memory_space<vmem>>, vector<8x32xf32>
    %cst_13 = arith.constant dense<0.000000e+00> : vector<8x256xf32>
    %13 = tpu.matmul %12, %11, %cst_13 {dimension_numbers = #tpu.dot_dimension_numbers<[1], [1], [0], [0], [0, 0, 1, 0], [], []>} : vector<8x32xf32>, vector<256x32xf32>, vector<8x256xf32> -> vector<8x256xf32>
    %c0_14 = arith.constant 0 : index
    %c0_15 = arith.constant 0 : index
    %14 = memref.load %arg7[%c0_14, %c0_15] : memref<1x1xf32, #tpu.memory_space<smem>>
    %15 = vector.broadcast %14 : f32 to vector<8x256xf32>
    %16 = arith.addf %13, %15 : vector<8x256xf32>
    %17 = arith.negf %16 : vector<8x256xf32>
    %18 = math.exp %17 : vector<8x256xf32>
    %cst_16 = arith.constant 1.000000e+00 : f32
    %19 = vector.broadcast %cst_16 : f32 to vector<8x256xf32>
    %20 = arith.addf %19, %18 : vector<8x256xf32>
    %21 = arith.divf %19, %20 : vector<8x256xf32>
    %c0_17 = arith.constant 0 : index
    %c0_18 = arith.constant 0 : index
    %22 = vector.load %arg8[%c0_17, %c0_18] : memref<8x256xf32, #tpu.memory_space<vmem>>, vector<8x256xf32>
    tpu.vector_store %arg8[%c0_17, %c0_18], %21 {strides = array<i32>} : memref<8x256xf32, #tpu.memory_space<vmem>>, vector<8x256xf32>,
    return
  }
  func.func @transform_0(%arg0: i32) -> (i32, i32) {
    %c0_i32 = arith.constant 0 : i32
    %c0_i32_0 = arith.constant 0 : i32
    return %arg0, %c0_i32 : i32, i32
  }
  func.func @transform_1(%arg0: i32) -> (i32, i32) {
    %c0_i32 = arith.constant 0 : i32
    %c0_i32_0 = arith.constant 0 : i32
    return %arg0, %c0_i32 : i32, i32
  }
  func.func @transform_2(%arg0: i32) -> (i32, i32) {
    %c0_i32 = arith.constant 0 : i32
    %c0_i32_0 = arith.constant 0 : i32
    %c0_i32_1 = arith.constant 0 : i32
    return %c0_i32, %c0_i32_0 : i32, i32
  }
  func.func @transform_3(%arg0: i32) -> (i32, i32) {
    %c0_i32 = arith.constant 0 : i32
    %c0_i32_0 = arith.constant 0 : i32
    %c0_i32_1 = arith.constant 0 : i32
    return %c0_i32, %c0_i32_0 : i32, i32
  }
  func.func @transform_4(%arg0: i32) -> (i32, i32) {
    %c0_i32 = arith.constant 0 : i32
    %c0_i32_0 = arith.constant 0 : i32
    %c0_i32_1 = arith.constant 0 : i32
    return %c0_i32, %c0_i32_0 : i32, i32
  }
  func.func @transform_5(%arg0: i32) -> (i32, i32) {
    %c0_i32 = arith.constant 0 : i32
    %c0_i32_0 = arith.constant 0 : i32
    %c0_i32_1 = arith.constant 0 : i32
    return %c0_i32, %c0_i32_0 : i32, i32
  }
  func.func @transform_6(%arg0: i32) -> (i32, i32) {
    %c0_i32 = arith.constant 0 : i32
    %c0_i32_0 = arith.constant 0 : i32
    %c0_i32_1 = arith.constant 0 : i32
    return %c0_i32, %c0_i32_0 : i32, i32
  }
  func.func @transform_7(%arg0: i32) -> (i32, i32) {
    %c0_i32 = arith.constant 0 : i32
    %c0_i32_0 = arith.constant 0 : i32
    return %c0_i32, %arg0 : i32, i32
  }
}

</mosaic_0001>

<bundles_post_ra>
// kernel: mlp_predictor_scores.1
= control target key start
LH: loop header
LB: loop body
LE: loop exit
PB: predicated region body
PF: predicated region fallthrough
CT: control target
= control target key end

     0   :  { %s1749_s26 = smov 0   ;;  %s1961_s0 = inlined_call_operand.vmem [shape: bf16[1024,32], index: 0, kind: input, shape index: {}]   ;;  %s1962_s1 = inlined_call_operand.vmem [shape: bf16[1024,32], index: 1, kind: input, shape index: {}]   ;;  %s1963_s2 = inlined_call_operand.vmem [shape: bf16[32,32], index: 2, kind: input, shape index: {}]   ;;  %s1964_s3 = inlined_call_operand.vmem [shape: bf16[32,32], index: 3, kind: input, shape index: {}]   ;;  %s1965_s4 = inlined_call_operand.vmem [shape: f32[1,32], index: 4, kind: input, shape index: {}]   ;;  %s1966_s5 = inlined_call_operand.vmem [shape: f32[8,32], index: 5, kind: input, shape index: {}]   ;;  %s1967_s6 = inlined_call_operand.<no memory space> [shape: f32[1,1], index: 6, kind: input, shape index: {}]   ;;  %s1968_s7 = inlined_call_operand.vmem [shape: f32[8,1024], index: 7, kind: output, shape index: {}]  }
   0x1   :  { %12 = sst [smem:[#allocation2]] %s1967_s6 }
   0x2 LB: > { %s1307_s27 = sadd.s32 4294967295, %s1704_s26   ;;  %p1311_p0 = scmp.ge.s32.totalorder %s1704_s26, 1  ;;  %s1704_s26 = sphi %s1749_s26, %s18_s26  }
   0x3   : > { %p250_p1 = scmp.lt.s32.totalorder %s1704_s26, 5 }
   0x5   : > { %p251_p2 = pnand %p1311_p0, %p250_p1 }
   0x6   : > { %v1654_v0 = vld [vmem:[%s1964_s3] sm:$0xff] (!%p251_p2)   ;;  %s1312_s6 = sshll.u32 (!%p251_p2), %s1307_s27, 5  ;;  %v1656_v2 = vld [vmem:[%s1964_s3 + $0x8] sm:$0xff] (!%p251_p2)   ;;  %vm470_vm0 = vcmask (!%p251_p2), 261120   ;;  %s1053_s24 = sld [smem:[#allocation2]] (!%p251_p2) }
   0x7   : > { %254 = sbr.rel (%p251_p2) target bundleno = 581 (0x245), region = 48  ;;  %v1655_v1 = vld [vmem:[%s1963_s2] sm:$0xff] (!%p251_p2)   ;;  %p288_p3 = scmp.lt.s32.totalorder (!%p251_p2), %s1312_s6, 127  ;;  %1494 = vmatprep.subr.bf16.mxu1 (!%p251_p2), %v1654_v0  ;;  %v1657_v3 = vld [vmem:[%s1963_s2 + $0x8] sm:$0xff] (!%p251_p2)   ;;  %vm1895_vm1 = vmpackc.low (!%p251_p2), %vm470_vm0, %vm470_vm0 }
   0x8   : > { %1530 = vmatprep.subr.bf16.mxu0 (!%p251_p2), %v1655_v1  ;;  %1495 = vmatpush3.bf16.msra.mxu1 (!%p251_p2), %v1654_v0  ;;  %v1848_v36 = vld [vmem:[%s1966_s5] sm:$0xff] (!%p251_p2)  ;;  %s1316_s25 = sshll.u32 (!%p251_p2), %s1307_s27, 1 }
   0x9   : > { %1531 = vmatpush3.bf16.msra.mxu0 (!%p251_p2), %v1655_v1  ;;  %1496 = vmatprep.subr.bf16.mxu1 (!%p251_p2), %v1656_v2  ;;  %v1855_v39 = vld [vmem:[%s1965_s4] ss:$0 sm:$0xff] (!%p251_p2)  ;;  %p300_p4 = scmp.lt.s32.totalorder (!%p251_p2), %s1316_s25, 7 }
   0xa   : > { %1532 = vmatprep.subr.bf16.mxu0 (!%p251_p2), %v1657_v3 }
   0xc   : > { %1497 = vmatpush3.bf16.msra.mxu1 (!%p251_p2), %v1656_v2 }
   0xd   : > { %1533 = vmatpush3.bf16.msra.mxu0 (!%p251_p2), %v1657_v3 }
   0xe   : > { %s1972_s6 = smov (!%p288_p3, %s1312_s6), 127  ;;  %s1974_s25 = smov (!%p300_p4, %s1316_s25), 7 }
   0xf   : > { %s1313_s13 = sshll.u32 %s1972_s6, 2  ;;  %s1317_s28 = sshll.u32 %s1974_s25, 3 }
  0x10   : > { %s1774_s16 = scalar_lea.vmem %s1962_s1, %s1313_s13  ;;  %s1779_s19 = scalar_lea.vmem %s1961_s0, %s1313_s13 }
  0x11   : > { %v1658_v4 = vld [vmem:[%s1774_s16] sm:$0xff]   ;;  %v1660_v6 = vld [vmem:[%s1774_s16 + $0x8] sm:$0xff]   ;;  %v1662_v8 = vld [vmem:[%s1774_s16 + $0x10] sm:$0xff]   ;;  %s303_s30 = scalar_lea.vmem %s1968_s7, %s1317_s28 }
  0x12   : > { %v1659_v5 = vld [vmem:[%s1779_s19] sm:$0xff]   ;;  %1498 = vmatprep.mubr.msk.bf16.mxu1 %vm470_vm0, %v1658_v4  ;;  %v1661_v7 = vld [vmem:[%s1779_s19 + $0x8] sm:$0xff]   ;;  %v1663_v9 = vld [vmem:[%s1779_s19 + $0x10] sm:$0xff]  }
  0x13   : > { %1534 = vmatprep.mubr.msk.bf16.mxu0 %vm470_vm0, %v1659_v5  ;;  %1499 = vmatmul.mubr.msk.bf16.vlgmr.msra.gmra.mrb[0].mxu1 %vm470_vm0, %v1660_v6  ;;  %v1664_v10 = vld [vmem:[%s1774_s16 + $0x18] sm:$0xff]   ;;  %v1666_v12 = vld [vmem:[%s1774_s16 + $0x20] sm:$0xff]   ;;  %v1668_v14 = vld [vmem:[%s1774_s16 + $0x28] sm:$0xff]  }
  0x14   : > { %1535 = vmatmul.mubr.msk.bf16.vlgmr.msra.gmra.mrb[0].mxu0 %vm470_vm0, %v1661_v7  ;;  %1502 = vmatprep.mubr.msk.bf16.mxu1 %vm470_vm0, %v1662_v8  ;;  %v1665_v11 = vld [vmem:[%s1779_s19 + $0x18] sm:$0xff]   ;;  %v1667_v13 = vld [vmem:[%s1779_s19 + $0x20] sm:$0xff]   ;;  %v1669_v15 = vld [vmem:[%s1779_s19 + $0x28] sm:$0xff]  }
  0x15   : > { %1538 = vmatprep.mubr.msk.bf16.mxu0 %vm470_vm0, %v1663_v9  ;;  %v1670_v16 = vld [vmem:[%s1774_s16 + $0x30] sm:$0xff]   ;;  %v1672_v18 = vld [vmem:[%s1774_s16 + $0x38] sm:$0xff]   ;;  %v1674_v20 = vld [vmem:[%s1774_s16 + $0x40] sm:$0xff]  }
  0x16   : > { %v1671_v17 = vld [vmem:[%s1779_s19 + $0x30] sm:$0xff]   ;;  %v1673_v19 = vld [vmem:[%s1779_s19 + $0x38] sm:$0xff]   ;;  %v1675_v21 = vld [vmem:[%s1779_s19 + $0x40] sm:$0xff]  }
  0x17   : > { %v1676_v22 = vld [vmem:[%s1774_s16 + $0x48] sm:$0xff]   ;;  %v1678_v24 = vld [vmem:[%s1774_s16 + $0x50] sm:$0xff]   ;;  %v1680_v26 = vld [vmem:[%s1774_s16 + $0x58] sm:$0xff]  }
  0x18   : > { %v1677_v23 = vld [vmem:[%s1779_s19 + $0x48] sm:$0xff]   ;;  %v1679_v25 = vld [vmem:[%s1779_s19 + $0x50] sm:$0xff]   ;;  %v1681_v27 = vld [vmem:[%s1779_s19 + $0x58] sm:$0xff]  }
  0x19   : > { %v1682_v28 = vld [vmem:[%s1774_s16 + $0x60] sm:$0xff]   ;;  %v1684_v30 = vld [vmem:[%s1774_s16 + $0x68] sm:$0xff]   ;;  %v1686_v32 = vld [vmem:[%s1774_s16 + $0x70] sm:$0xff]  }
  0x1a   : > { %v1683_v29 = vld [vmem:[%s1779_s19 + $0x60] sm:$0xff]   ;;  %v1685_v31 = vld [vmem:[%s1779_s19 + $0x68] sm:$0xff]   ;;  %v1687_v33 = vld [vmem:[%s1779_s19 + $0x70] sm:$0xff]  }
  0x1b   : > { %1503 = vmatmul.mubr.msk.bf16.gmra.mrb[4].mxu1 %vm470_vm0, %v1664_v10  ;;  %v1688_v34 = vld [vmem:[%s1774_s16 + $0x78] sm:$0xff]  }
  0x1c   : > { %1539 = vmatmul.mubr.msk.bf16.gmra.mrb[4].mxu0 %vm470_vm0, %v1665_v11  ;;  %1506 = vmatprep.mubr.msk.bf16.mxu1 %vm470_vm0, %v1666_v12  ;;  %v1689_v35 = vld [vmem:[%s1779_s19 + $0x78] sm:$0xff]  }
  0x1d   : > { %1542 = vmatprep.mubr.msk.bf16.mxu0 %vm470_vm0, %v1667_v13 }
  0x23   : > { %1507 = vmatmul.mubr.msk.bf16.gmra.mrb[8].mxu1 %vm470_vm0, %v1668_v14 }
  0x24   : > { %1543 = vmatmul.mubr.msk.bf16.gmra.mrb[8].mxu0 %vm470_vm0, %v1669_v15  ;;  %1510 = vmatprep.mubr.msk.bf16.mxu1 %vm470_vm0, %v1670_v16 }
  0x25   : > { %1546 = vmatprep.mubr.msk.bf16.mxu0 %vm470_vm0, %v1671_v17 }
  0x2b   : > { %1511 = vmatmul.mubr.msk.bf16.gmra.mrb[12].mxu1 %vm470_vm0, %v1672_v18 }
  0x2c   : > { %1547 = vmatmul.mubr.msk.bf16.gmra.mrb[12].mxu0 %vm470_vm0, %v1673_v19  ;;  %1514 = vmatprep.mubr.msk.bf16.mxu1 %vm470_vm0, %v1674_v20 }
  0x2d   : > { %1550 = vmatprep.mubr.msk.bf16.mxu0 %vm470_vm0, %v1675_v21 }
  0x33   : > { %1515 = vmatmul.mubr.msk.bf16.gmra.mrb[16].mxu1 %vm470_vm0, %v1676_v22 }
  0x34   : > { %1551 = vmatmul.mubr.msk.bf16.gmra.mrb[16].mxu0 %vm470_vm0, %v1677_v23  ;;  %1518 = vmatprep.mubr.msk.bf16.mxu1 %vm470_vm0, %v1678_v24 }
  0x35   : > { %1554 = vmatprep.mubr.msk.bf16.mxu0 %vm470_vm0, %v1679_v25 }
  0x3b   : > { %1519 = vmatmul.mubr.msk.bf16.gmra.mrb[20].mxu1 %vm470_vm0, %v1680_v26 }
  0x3c   : > { %1555 = vmatmul.mubr.msk.bf16.gmra.mrb[20].mxu0 %vm470_vm0, %v1681_v27  ;;  %1522 = vmatprep.mubr.msk.bf16.mxu1 %vm470_vm0, %v1682_v28 }
  0x3d   : > { %1558 = vmatprep.mubr.msk.bf16.mxu0 %vm470_vm0, %v1683_v29 }
  0x43   : > { %1523 = vmatmul.mubr.msk.bf16.gmra.mrb[24].mxu1 %vm470_vm0, %v1684_v30 }
  0x44   : > { %1559 = vmatmul.mubr.msk.bf16.gmra.mrb[24].mxu0 %vm470_vm0, %v1685_v31  ;;  %1526 = vmatprep.mubr.msk.bf16.mxu1 %vm470_vm0, %v1686_v32 }
  0x45   : > { %1562 = vmatprep.mubr.msk.bf16.mxu0 %vm470_vm0, %v1687_v33 }
  0x4b   : > { %1527 = vmatmul.mubr.msk.bf16.gmra.mrb[28].mxu1 %vm470_vm0, %v1688_v34 }
  0x4c   : > { %1563 = vmatmul.mubr.msk.bf16.gmra.mrb[28].mxu0 %vm470_vm0, %v1689_v35  ;;  %1492 = vmatprep.mubr.msk.f32.mxu1 %vm470_vm0, %v1848_v36 }
  0xe6   : > { %v1500_v37 = vpop.f32.mrb[0].mxu1 }
  0xe7   : > { %v1536_v38 = vpop.f32.mrb[0].mxu0  ;;  %v553_v40 = vpop.f32.mrb[1].mxu1 }
  0xe8   : > { %v863_v41 = vadd.f32 %v1536_v38, %v1500_v37  ;;  %v854_v42 = vpop.f32.mrb[1].mxu0  ;;  %v1501_v43 = vpop.f32.mrb[2].mxu1 }
  0xe9   : > { %v855_v44 = vadd.f32 %v854_v42, %v553_v40  ;;  %v1537_v45 = vpop.f32.mrb[2].mxu0  ;;  %v556_v46 = vpop.f32.mrb[3].mxu1 }
  0xea   : > { %v990_v47 = vadd.f32 %v1855_v39, %v863_v41  ;;  %v866_v48 = vadd.f32 %v1537_v45, %v1501_v43  ;;  %v857_v49 = vpop.f32.mrb[3].mxu0 }
  0xeb   : > { %v988_v50 = vadd.f32 %v1855_v39, %v855_v44  ;;  %v858_v51 = vadd.f32 %v857_v49, %v556_v46 }
  0xec   : > { %v991_v52 = vadd.f32 %v1855_v39, %v866_v48  ;;  %v1022_v54 = vmax.f32 %v990_v47, 0.0 }
  0xed   : > { %v989_v53 = vadd.f32 %v1855_v39, %v858_v51  ;;  %v1020_v57 = vmax.f32 %v988_v50, 0.0 }
  0xee   : > { %v1023_v55 = vmax.f32 %v991_v52, 0.0  ;;  %v1504_v56 = vpop.f32.mrb[4].mxu1 }
  0xef   : > { %v1021_v58 = vmax.f32 %v989_v53, 0.0  ;;  %v1540_v59 = vpop.f32.mrb[4].mxu0  ;;  %v569_v60 = vpop.f32.mrb[5].mxu1 }
  0xf0   : > { %v1861_v61 = vpack.c.bf16 %v1023_v55, %v1022_v54  ;;  %v879_v62 = vadd.f32 %v1540_v59, %v1504_v56  ;;  %v870_v63 = vpop.f32.mrb[5].mxu0  ;;  %v1505_v0 = vpop.f32.mrb[6].mxu1 }
  0xf1   : > { %v1863_v1 = vpack.c.bf16 %v1021_v58, %v1020_v57  ;;  %v871_v2 = vadd.f32 %v870_v63, %v569_v60  ;;  %v1541_v3 = vpop.f32.mrb[6].mxu0  ;;  %v572_v4 = vpop.f32.mrb[7].mxu1 }
  0xf2   : > { %v994_v5 = vadd.f32 %v1855_v39, %v879_v62  ;;  %v882_v6 = vadd.f32 %v1541_v3, %v1505_v0  ;;  %v873_v7 = vpop.f32.mrb[7].mxu0 }
  0xf3   : > { %v992_v8 = vadd.f32 %v1855_v39, %v871_v2  ;;  %v874_v9 = vadd.f32 %v873_v7, %v572_v4 }
  0xf4   : > { %v995_v10 = vadd.f32 %v1855_v39, %v882_v6  ;;  %v1026_v12 = vmax.f32 %v994_v5, 0.0 }
  0xf5   : > { %v993_v11 = vadd.f32 %v1855_v39, %v874_v9  ;;  %v1024_v15 = vmax.f32 %v992_v8, 0.0 }
  0xf6   : > { %v1027_v13 = vmax.f32 %v995_v10, 0.0  ;;  %v1508_v14 = vpop.f32.mrb[8].mxu1 }
  0xf7   : > { %v1025_v16 = vmax.f32 %v993_v11, 0.0  ;;  %v1544_v17 = vpop.f32.mrb[8].mxu0  ;;  %v585_v18 = vpop.f32.mrb[9].mxu1 }
  0xf8   : > { %v1869_v19 = vpack.c.bf16 %v1027_v13, %v1026_v12  ;;  %v895_v20 = vadd.f32 %v1544_v17, %v1508_v14  ;;  %v886_v21 = vpop.f32.mrb[9].mxu0  ;;  %v1509_v22 = vpop.f32.mrb[10].mxu1 }
  0xf9   : > { %v1871_v23 = vpack.c.bf16 %v1025_v16, %v1024_v15  ;;  %v887_v24 = vadd.f32 %v886_v21, %v585_v18  ;;  %v1545_v25 = vpop.f32.mrb[10].mxu0  ;;  %v588_v26 = vpop.f32.mrb[11].mxu1 }
  0xfa   : > { %v998_v27 = vadd.f32 %v1855_v39, %v895_v20  ;;  %v898_v28 = vadd.f32 %v1545_v25, %v1509_v22  ;;  %v889_v29 = vpop.f32.mrb[11].mxu0 }
  0xfb   : > { %v996_v30 = vadd.f32 %v1855_v39, %v887_v24  ;;  %v890_v31 = vadd.f32 %v889_v29, %v588_v26 }
  0xfc   : > { %v999_v32 = vadd.f32 %v1855_v39, %v898_v28  ;;  %v1030_v34 = vmax.f32 %v998_v27, 0.0 }
  0xfd   : > { %v997_v33 = vadd.f32 %v1855_v39, %v890_v31  ;;  %v1028_v38 = vmax.f32 %v996_v30, 0.0 }
  0xfe   : > { %v1031_v35 = vmax.f32 %v999_v32, 0.0  ;;  %v1512_v37 = vpop.f32.mrb[12].mxu1 }
  0xff   : > { %v1029_v40 = vmax.f32 %v997_v33, 0.0  ;;  %v1548_v41 = vpop.f32.mrb[12].mxu0  ;;  %v601_v42 = vpop.f32.mrb[13].mxu1 }
 0x100   : > { %v1877_v43 = vpack.c.bf16 %v1031_v35, %v1030_v34  ;;  %v911_v44 = vadd.f32 %v1548_v41, %v1512_v37  ;;  %v902_v45 = vpop.f32.mrb[13].mxu0  ;;  %v1513_v46 = vpop.f32.mrb[14].mxu1 }
 0x101   : > { %v1879_v47 = vpack.c.bf16 %v1029_v40, %v1028_v38  ;;  %v903_v48 = vadd.f32 %v902_v45, %v601_v42  ;;  %v1549_v49 = vpop.f32.mrb[14].mxu0  ;;  %v604_v50 = vpop.f32.mrb[15].mxu1 }
 0x102   : > { %v1002_v51 = vadd.f32 %v1855_v39, %v911_v44  ;;  %v914_v52 = vadd.f32 %v1549_v49, %v1513_v46  ;;  %v905_v53 = vpop.f32.mrb[15].mxu0 }
 0x103   : > { %v1000_v54 = vadd.f32 %v1855_v39, %v903_v48  ;;  %v906_v55 = vadd.f32 %v905_v53, %v604_v50 }
 0x104   : > { %v1003_v56 = vadd.f32 %v1855_v39, %v914_v52  ;;  %v1034_v58 = vmax.f32 %v1002_v51, 0.0 }
 0x105   : > { %v1001_v57 = vadd.f32 %v1855_v39, %v906_v55  ;;  %v1032_v62 = vmax.f32 %v1000_v54, 0.0 }
 0x106   : > { %v1035_v59 = vmax.f32 %v1003_v56, 0.0  ;;  %v1516_v60 = vpop.f32.mrb[16].mxu1 }
 0x107   : > { %v1033_v63 = vmax.f32 %v1001_v57, 0.0  ;;  %v1552_v0 = vpop.f32.mrb[16].mxu0  ;;  %v617_v2 = vpop.f32.mrb[17].mxu1 }
 0x108   : > { %v1885_v3 = vpack.c.bf16 %v1035_v59, %v1034_v58  ;;  %v927_v4 = vadd.f32 %v1552_v0, %v1516_v60  ;;  %v918_v5 = vpop.f32.mrb[17].mxu0  ;;  %v1517_v6 = vpop.f32.mrb[18].mxu1 }
 0x109   : > { %v1887_v7 = vpack.c.bf16 %v1033_v63, %v1032_v62  ;;  %v919_v8 = vadd.f32 %v918_v5, %v617_v2  ;;  %v1553_v9 = vpop.f32.mrb[18].mxu0  ;;  %v620_v10 = vpop.f32.mrb[19].mxu1 }
 0x10a   : > { %v1006_v11 = vadd.f32 %v1855_v39, %v927_v4  ;;  %v930_v12 = vadd.f32 %v1553_v9, %v1517_v6  ;;  %v921_v13 = vpop.f32.mrb[19].mxu0 }
 0x10b   : > { %v1004_v14 = vadd.f32 %v1855_v39, %v919_v8  ;;  %v922_v15 = vadd.f32 %v921_v13, %v620_v10 }
 0x10c   : > { %v1007_v16 = vadd.f32 %v1855_v39, %v930_v12  ;;  %v1038_v18 = vmax.f32 %v1006_v11, 0.0 }
 0x10d   : > { %v1005_v17 = vadd.f32 %v1855_v39, %v922_v15  ;;  %v1036_v22 = vmax.f32 %v1004_v14, 0.0 }
 0x10e   : > { %v1039_v20 = vmax.f32 %v1007_v16, 0.0  ;;  %v1520_v21 = vpop.f32.mrb[20].mxu1 }
 0x10f   : > { %v1037_v24 = vmax.f32 %v1005_v17, 0.0  ;;  %v1556_v25 = vpop.f32.mrb[20].mxu0  ;;  %v633_v26 = vpop.f32.mrb[21].mxu1 }
 0x110   : > { %v1572_v27 = vpack.c.bf16 %v1039_v20, %v1038_v18  ;;  %v943_v29 = vadd.f32 %v1556_v25, %v1520_v21  ;;  %v934_v30 = vpop.f32.mrb[21].mxu0  ;;  %v1521_v31 = vpop.f32.mrb[22].mxu1 }
 0x111   : > { %v1566_v32 = vpack.c.bf16 %v1037_v24, %v1036_v22  ;;  %v935_v33 = vadd.f32 %v934_v30, %v633_v26  ;;  %v1557_v34 = vpop.f32.mrb[22].mxu0  ;;  %v636_v35 = vpop.f32.mrb[23].mxu1 }
 0x112   : > { %v1010_v37 = vadd.f32 %v1855_v39, %v943_v29  ;;  %v946_v38 = vadd.f32 %v1557_v34, %v1521_v31  ;;  %v937_v40 = vpop.f32.mrb[23].mxu0 }
 0x113   : > { %1568 = vmatprep.subr.msk.bf16.mxu1 %vm1895_vm1, %v1566_v32  ;;  %v1008_v41 = vadd.f32 %v1855_v39, %v935_v33  ;;  %v938_v42 = vadd.f32 %v937_v40, %v636_v35 }
 0x114   : > { %v1042_v44 = vmax.f32 %v1010_v37, 0.0  ;;  %1571 = vmatpush3.bf16.xpose.msk.msra.mxu1 %vm1895_vm1, %v1863_v1  ;;  %v1011_v45 = vadd.f32 %v1855_v39, %v946_v38 }
 0x115   : > { %v1040_v46 = vmax.f32 %v1008_v41, 0.0  ;;  %1574 = vmatprep.subr.msk.bf16.mxu1 %vm1895_vm1, %v1572_v27  ;;  %v1009_v48 = vadd.f32 %v1855_v39, %v938_v42 }
 0x116   : > { %v1043_v49 = vmax.f32 %v1011_v45, 0.0  ;;  %v1524_v50 = vpop.f32.mrb[24].mxu1 }
 0x117   : > { %v1041_v51 = vmax.f32 %v1009_v48, 0.0  ;;  %v1560_v52 = vpop.f32.mrb[24].mxu0  ;;  %v649_v53 = vpop.f32.mrb[25].mxu1 }
 0x118   : > { %v1584_v54 = vpack.c.bf16 %v1043_v49, %v1042_v44  ;;  %v959_v55 = vadd.f32 %v1560_v52, %v1524_v50  ;;  %v950_v56 = vpop.f32.mrb[25].mxu0  ;;  %v1525_v57 = vpop.f32.mrb[26].mxu1 }
 0x119   : > { %v1578_v58 = vpack.c.bf16 %v1041_v51, %v1040_v46  ;;  %v951_v59 = vadd.f32 %v950_v56, %v649_v53  ;;  %v1561_v1 = vpop.f32.mrb[26].mxu0  ;;  %v652_v60 = vpop.f32.mrb[27].mxu1 }
 0x11a   : > { %v1014_v62 = vadd.f32 %v1855_v39, %v959_v55  ;;  %v962_v63 = vadd.f32 %v1561_v1, %v1525_v57  ;;  %v953_v0 = vpop.f32.mrb[27].mxu0 }
 0x11b   : > { %v1012_v2 = vadd.f32 %v1855_v39, %v951_v59  ;;  %v954_v4 = vadd.f32 %v953_v0, %v652_v60 }
 0x11c   : > { %1577 = vmatpush3.bf16.xpose.msk.msra.mxu1 %vm1895_vm1, %v1861_v61  ;;  %v1046_v5 = vmax.f32 %v1014_v62, 0.0  ;;  %v1015_v6 = vadd.f32 %v1855_v39, %v962_v63 }
 0x11d   : > { %1580 = vmatprep.subr.msk.bf16.mxu1 %vm1895_vm1, %v1578_v58  ;;  %v1044_v8 = vmax.f32 %v1012_v2, 0.0  ;;  %v1013_v9 = vadd.f32 %v1855_v39, %v954_v4 }
 0x11e   : > { %v1047_v10 = vmax.f32 %v1015_v6, 0.0  ;;  %v1528_v11 = vpop.f32.mrb[28].mxu1 }
 0x11f   : > { %v1045_v12 = vmax.f32 %v1013_v9, 0.0  ;;  %v1564_v13 = vpop.f32.mrb[28].mxu0  ;;  %v665_v14 = vpop.f32.mrb[29].mxu1 }
 0x120   : > { %v1596_v15 = vpack.c.bf16 %v1047_v10, %v1046_v5  ;;  %v975_v16 = vadd.f32 %v1564_v13, %v1528_v11  ;;  %v966_v17 = vpop.f32.mrb[29].mxu0  ;;  %v1529_v18 = vpop.f32.mrb[30].mxu1 }
 0x121   : > { %v1590_v20 = vpack.c.bf16 %v1045_v12, %v1044_v8  ;;  %v967_v61 = vadd.f32 %v966_v17, %v665_v14  ;;  %v1565_v21 = vpop.f32.mrb[30].mxu0  ;;  %v668_v22 = vpop.f32.mrb[31].mxu1 }
 0x122   : > { %v1018_v24 = vadd.f32 %v1855_v39, %v975_v16  ;;  %v978_v25 = vadd.f32 %v1565_v21, %v1529_v18  ;;  %v969_v26 = vpop.f32.mrb[31].mxu0 }
 0x123   : > { %v1016_v27 = vadd.f32 %v1855_v39, %v967_v61  ;;  %v970_v29 = vadd.f32 %v969_v26, %v668_v22 }
 0x124   : > { %1583 = vmatpush3.bf16.xpose.msk.msra.mxu1 %vm1895_vm1, %v1871_v23  ;;  %v1050_v30 = vmax.f32 %v1018_v24, 0.0  ;;  %v1019_v31 = vadd.f32 %v1855_v39, %v978_v25 }
 0x125   : > { %1586 = vmatprep.subr.msk.bf16.mxu1 %vm1895_vm1, %v1584_v54  ;;  %v1048_v32 = vmax.f32 %v1016_v27, 0.0  ;;  %v1017_v33 = vadd.f32 %v1855_v39, %v970_v29  ;;  %v1054_v39 = vstv %s1053_s24 }
 0x126   : > { %v1051_v34 = vmax.f32 %v1019_v31, 0.0 }
 0x127   : > { %v1049_v35 = vmax.f32 %v1017_v33, 0.0 }
 0x128   : > { %v1608_v37 = vpack.c.bf16 %v1051_v34, %v1050_v30 }
 0x129   : > { %v1602_v38 = vpack.c.bf16 %v1049_v35, %v1048_v32 }
 0x12c   : > { %1589 = vmatpush3.bf16.xpose.msk.msra.mxu1 %vm1895_vm1, %v1869_v19 }
 0x12d   : > { %1592 = vmatprep.subr.msk.bf16.mxu1 %vm1895_vm1, %v1590_v20 }
 0x134   : > { %1595 = vmatpush3.bf16.xpose.msk.msra.mxu1 %vm1895_vm1, %v1879_v47 }
 0x135   : > { %1598 = vmatprep.subr.msk.bf16.mxu1 %vm1895_vm1, %v1596_v15 }
 0x13c   : > { %1601 = vmatpush3.bf16.xpose.msk.msra.mxu1 %vm1895_vm1, %v1877_v43 }
 0x13d   : > { %1604 = vmatprep.subr.msk.bf16.mxu1 %vm1895_vm1, %v1602_v38 }
 0x144   : > { %1607 = vmatpush3.bf16.xpose.msk.msra.mxu1 %vm1895_vm1, %v1887_v7 }
 0x145   : > { %1610 = vmatprep.subr.msk.bf16.mxu1 %vm1895_vm1, %v1608_v37 }
 0x14c   : > { %1613 = vmatpush3.bf16.xpose.msk.msra.mxu1 %vm1895_vm1, %v1885_v3 }
 0x153   : > { %1493 = vmatmul.mubr.msk.f32.vlgmr.msra.gmra.mrb[32].mxu1 %vm470_vm0, %v1848_v36 }
 0x226   : > { %v1220_v19 = vpop.f32.mrb[32].mxu1 }
 0x227   : > { %v1221_v23 = vadd.f32 %v1220_v19, %v1054_v39  ;;  %v1222_v43 = vpop.f32.mrb[33].mxu1 }
 0x228   : > { %v1223_v47 = vadd.f32 %v1222_v43, %v1054_v39 }
 0x229   : > { %v1420_v40 = vmul.f32 -1.442695, %v1221_v23 }
 0x22a   : > { %v1421_v41 = vmul.f32 -1.442695, %v1223_v47 }
 0x22b   : > { %1690 = vpow2.f32 %v1420_v40 }
 0x22c   : > { %1692 = vpow2.f32 %v1421_v41 }
 0x235   : > { %v1691_v7 = vpop.eup %1690 }
 0x236   : > { %v1693_v42 = vpop.eup %1692  ;;  %v1231_v28 = vadd.f32 1.0, %v1691_v7 }
 0x237   : > { %v1232_v3 = vadd.f32 1.0, %v1693_v42 }
 0x238   : > { %1694 = vrcp.f32 %v1231_v28 }
 0x239   : > { %1696 = vrcp.f32 %v1232_v3 }
 0x242   : > { %v1695_v36 = vpop.eup %1694 }
 0x243   : > { %v1697_v44 = vpop.eup %1696  ;;  %1237 = vst [vmem:[%s303_s30] sm:$0xff] %v1695_v36 }
 0x244   : > { %1238 = vst [vmem:[%s303_s30 + $0x8] sm:$0xff] %v1697_v44 }
 0x245 PF: > { %s18_s26 = sadd.s32 1, %s1704_s26  }
 0x246   : > { %p15_p5 = scmp.ge.s32.totalorder %s18_s26, 6  }
 0x248   :  { %17 = sbr.rel (!%p15_p5) target bundleno = 2 (0x2), region = 81 }

</bundles_post_ra>
